<compile_context>
chip_gen: v6e
topology: v6e:2x2x1
jax: 0.10.0
libtpu: 0.0.40
codegen_flags: <defaults>
</compile_context>

<pallas_src>
import functools

import jax
import jax.numpy as jnp
from jax.experimental import pallas as pl
from jax.experimental.pallas import tpu as pltpu


STATE_DIM = 3
ACTION_DIM = 3
HIDDEN = 100
TILE_B = 512        # max batch-tile (rows per grid step), multiple of 8
LANE = 128          # hidden padded to a lane multiple


def _mlp_residual_kernel(s_ref, a_ref,
                         w1s_ref, w1a_ref, b1_ref,
                         w2_ref, b2_ref,
                         w3_ref, b3_ref,
                         o_ref):
    """One batch tile: out = state + MLP([state, action]) with w1 pre-split."""
    s = s_ref[...]                                    # (tile_b, state_dim)
    a = a_ref[...]                                    # (tile_b, action_dim)
    h1 = (jnp.dot(s, w1s_ref[...], preferred_element_type=jnp.float32)
          + jnp.dot(a, w1a_ref[...], preferred_element_type=jnp.float32)
          + b1_ref[...])
    h1 = jnp.maximum(h1, 0.0)                         # ReLU
    h2 = jnp.dot(h1, w2_ref[...], preferred_element_type=jnp.float32) + b2_ref[...]
    h2 = jnp.maximum(h2, 0.0)                         # ReLU
    delta = jnp.dot(h2, w3_ref[...], preferred_element_type=jnp.float32) + b3_ref[...]
    o_ref[...] = s + delta                            # residual: s_{t+1} = s_t + f(s_t, u_t)


def init_params(key, state_dim=STATE_DIM, action_dim=ACTION_DIM, hidden=HIDDEN):
    """Deterministic parameter init (Kaiming-ish scaled normal), f32."""
    in_dim = state_dim + action_dim
    k1, k2, k3, k4, k5, k6 = jax.random.split(key, 6)
    return {
        "w1": jax.random.normal(k1, (in_dim, hidden), jnp.float32) / jnp.sqrt(in_dim),
        "b1": jax.random.normal(k2, (1, hidden), jnp.float32) * 0.01,
        "w2": jax.random.normal(k3, (hidden, hidden), jnp.float32) / jnp.sqrt(hidden),
        "b2": jax.random.normal(k4, (1, hidden), jnp.float32) * 0.01,
        "w3": jax.random.normal(k5, (hidden, state_dim), jnp.float32) / jnp.sqrt(hidden),
        "b3": jax.random.normal(k6, (1, state_dim), jnp.float32) * 0.01,
    }


@functools.partial(jax.jit, static_argnames=("tile_b",))
def residual_dynamics_forward(state, action, params, tile_b=TILE_B):
    """next_state = state + MLP(concat(state, action)); supports leading dims (...)."""
    state_dim = state.shape[-1]
    action_dim = action.shape[-1]
    lead_shape = state.shape[:-1]

    # --- flatten leading dims (no concat, no duplicate state copy) ---
    s2 = state.reshape(-1, state_dim).astype(jnp.float32)
    a2 = action.reshape(-1, action_dim).astype(jnp.float32)
    n = s2.shape[0]

    # Adaptive tile: one step for tiny batches, tile_b rows for large batches.
    eff_tile = min(tile_b, pl.cdiv(n, 8) * 8)
    n_pad = pl.cdiv(n, eff_tile) * eff_tile
    if n_pad != n:  # pad only when necessary
        s2 = jnp.pad(s2, ((0, n_pad - n), (0, 0)))
        a2 = jnp.pad(a2, ((0, n_pad - n), (0, 0)))

    # --- prepare weights: split w1 (concat fusion) and pad hidden to 128 ---
    hidden = params["w1"].shape[1]
    hid_pad = pl.cdiv(hidden, LANE) * LANE
    hp = hid_pad - hidden
    w1 = jnp.pad(params["w1"], ((0, 0), (0, hp)))
    w1_s = w1[:state_dim]                              # (state_dim, hid_pad)
    w1_a = w1[state_dim:]                              # (action_dim, hid_pad)
    b1 = jnp.pad(params["b1"], ((0, 0), (0, hp)))
    w2 = jnp.pad(params["w2"], ((0, hp), (0, hp)))
    b2 = jnp.pad(params["b2"], ((0, 0), (0, hp)))
    w3 = jnp.pad(params["w3"], ((0, hp), (0, 0)))
    b3 = params["b3"]

    full = lambda i: (0, 0)  # weights/biases: whole array resident every step

    out = pl.pallas_call(
        _mlp_residual_kernel,
        out_shape=jax.ShapeDtypeStruct((n_pad, state_dim), jnp.float32),
        grid=(n_pad // eff_tile,),
        in_specs=[
            pl.BlockSpec((eff_tile, state_dim), lambda i: (i, 0)),   # state
            pl.BlockSpec((eff_tile, action_dim), lambda i: (i, 0)),  # action
            pl.BlockSpec((state_dim, hid_pad), full),                # w1_s
            pl.BlockSpec((action_dim, hid_pad), full),               # w1_a
            pl.BlockSpec((1, hid_pad), full),                        # b1
            pl.BlockSpec((hid_pad, hid_pad), full),                  # w2
            pl.BlockSpec((1, hid_pad), full),                        # b2
            pl.BlockSpec((hid_pad, state_dim), full),                # w3
            pl.BlockSpec((1, state_dim), full),                      # b3
        ],
        out_specs=pl.BlockSpec((eff_tile, state_dim), lambda i: (i, 0)),
        compiler_params=pltpu.CompilerParams(
            dimension_semantics=("parallel",),
            vmem_limit_bytes=32 << 20),
    )(s2, a2, w1_s, w1_a, b1, w2, b2, w3, b3)

    return out[:n].reshape(*lead_shape, state_dim)


def _reference_forward(state, action, params):
    """Pure-JAX reference (mirrors the PyTorch forward exactly)."""
    x = jnp.concatenate([state, action], axis=-1)
    h1 = jnp.maximum(x @ params["w1"] + params["b1"][0], 0.0)
    h2 = jnp.maximum(h1 @ params["w2"] + params["b2"][0], 0.0)
    delta = h2 @ params["w3"] + params["b3"][0]
    return state + delta


if __name__ == "__main__":
    key = jax.random.PRNGKey(0)
    k_param, k_state, k_action = jax.random.split(key, 3)

    params = init_params(k_param)

    # Small shapes with leading dims to exercise the (..., dim) contract.
    state = jax.random.normal(k_state, (2, 5, STATE_DIM), jnp.float32)
    action = jax.random.normal(k_action, (2, 5, ACTION_DIM), jnp.float32)

    next_state = residual_dynamics_forward(state, action, params)
    next_state = jax.block_until_ready(next_state)

    ref = _reference_forward(state, action, params)
    assert next_state.shape == state.shape
    assert jnp.allclose(next_state, ref, atol=1e-5, rtol=1e-5), (
        f"max err = {jnp.max(jnp.abs(next_state - ref))}")

    # Larger batch to exercise multi-step tiling (grid > 1, padded batch path).
    kb1, kb2 = jax.random.split(jax.random.PRNGKey(1))
    big_state = jax.random.normal(kb1, (1300, STATE_DIM), jnp.float32)
    big_action = jax.random.normal(kb2, (1300, ACTION_DIM), jnp.float32)
    big_out = jax.block_until_ready(
        residual_dynamics_forward(big_state, big_action, params))
    big_ref = _reference_forward(big_state, big_action, params)
    assert jnp.allclose(big_out, big_ref, atol=1e-5, rtol=1e-5), (
        f"max err (big) = {jnp.max(jnp.abs(big_out - big_ref))}")

    print("KERNEL_OK")
</pallas_src>

<mosaic_0001>
module attributes {stable_mosaic.version = 11 : i64} {
  func.func @_mlp_residual_kernel(%arg0: i32, %arg1: memref<16x3xf32, #tpu.memory_space<vmem>>, %arg2: memref<16x3xf32, #tpu.memory_space<vmem>>, %arg3: memref<3x128xf32, #tpu.memory_space<vmem>>, %arg4: memref<3x128xf32, #tpu.memory_space<vmem>>, %arg5: memref<1x128xf32, #tpu.memory_space<vmem>>, %arg6: memref<128x128xf32, #tpu.memory_space<vmem>>, %arg7: memref<1x128xf32, #tpu.memory_space<vmem>>, %arg8: memref<128x3xf32, #tpu.memory_space<vmem>>, %arg9: memref<1x3xf32, #tpu.memory_space<vmem>>, %arg10: memref<16x3xf32, #tpu.memory_space<vmem>>) attributes {dimension_semantics = [#tpu.dimension_semantics<parallel>], iteration_bounds = array<i64: 1>, scalar_prefetch = 0 : i64, scratch_operands = 0 : i64, tpu.core_type = #tpu.core_type<tc>, window_params = [{transform_indices = @transform_0, window_bounds = array<i64: 16, 3>}, {transform_indices = @transform_1, window_bounds = array<i64: 16, 3>}, {pipeline_mode = #tpu.pipeline_mode<synchronous>, transform_indices = @transform_2, window_bounds = array<i64: 3, 128>}, {pipeline_mode = #tpu.pipeline_mode<synchronous>, transform_indices = @transform_3, window_bounds = array<i64: 3, 128>}, {pipeline_mode = #tpu.pipeline_mode<synchronous>, transform_indices = @transform_4, window_bounds = array<i64: 1, 128>}, {pipeline_mode = #tpu.pipeline_mode<synchronous>, transform_indices = @transform_5, window_bounds = array<i64: 128, 128>}, {pipeline_mode = #tpu.pipeline_mode<synchronous>, transform_indices = @transform_6, window_bounds = array<i64: 1, 128>}, {pipeline_mode = #tpu.pipeline_mode<synchronous>, transform_indices = @transform_7, window_bounds = array<i64: 128, 3>}, {pipeline_mode = #tpu.pipeline_mode<synchronous>, transform_indices = @transform_8, window_bounds = array<i64: 1, 3>}, {transform_indices = @transform_9, window_bounds = array<i64: 16, 3>}]} {
    %c0 = arith.constant 0 : index
    %c0_0 = arith.constant 0 : index
    %0 = vector.load %arg1[%c0, %c0_0] : memref<16x3xf32, #tpu.memory_space<vmem>>, vector<16x3xf32>
    %c0_1 = arith.constant 0 : index
    %c0_2 = arith.constant 0 : index
    %1 = vector.load %arg2[%c0_1, %c0_2] : memref<16x3xf32, #tpu.memory_space<vmem>>, vector<16x3xf32>
    %c0_3 = arith.constant 0 : index
    %c0_4 = arith.constant 0 : index
    %2 = vector.load %arg3[%c0_3, %c0_4] : memref<3x128xf32, #tpu.memory_space<vmem>>, vector<3x128xf32>
    %cst = arith.constant dense<0.000000e+00> : vector<16x128xf32>
    %3 = tpu.matmul %0, %2, %cst {dimension_numbers = #tpu.dot_dimension_numbers<[1], [0], [0], [1], [0, 0, 1, 1], [], []>} : vector<16x3xf32>, vector<3x128xf32>, vector<16x128xf32> -> vector<16x128xf32>
    %c0_5 = arith.constant 0 : index
    %c0_6 = arith.constant 0 : index
    %4 = vector.load %arg4[%c0_5, %c0_6] : memref<3x128xf32, #tpu.memory_space<vmem>>, vector<3x128xf32>
    %cst_7 = arith.constant dense<0.000000e+00> : vector<16x128xf32>
    %5 = tpu.matmul %1, %4, %cst_7 {dimension_numbers = #tpu.dot_dimension_numbers<[1], [0], [0], [1], [0, 0, 1, 1], [], []>} : vector<16x3xf32>, vector<3x128xf32>, vector<16x128xf32> -> vector<16x128xf32>
    %6 = arith.addf %3, %5 : vector<16x128xf32>
    %c0_8 = arith.constant 0 : index
    %c0_9 = arith.constant 0 : index
    %7 = vector.load %arg5[%c0_8, %c0_9] : memref<1x128xf32, #tpu.memory_space<vmem>>, vector<1x128xf32>
    %8 = vector.broadcast %7 : vector<1x128xf32> to vector<16x128xf32>
    %9 = arith.addf %6, %8 : vector<16x128xf32>
    %cst_10 = arith.constant 0.000000e+00 : f32
    %10 = vector.broadcast %cst_10 : f32 to vector<16x128xf32>
    %11 = arith.maximumf %9, %10 : vector<16x128xf32>
    %c0_11 = arith.constant 0 : index
    %c0_12 = arith.constant 0 : index
    %12 = vector.load %arg6[%c0_11, %c0_12] : memref<128x128xf32, #tpu.memory_space<vmem>>, vector<128x128xf32>
    %cst_13 = arith.constant dense<0.000000e+00> : vector<16x128xf32>
    %13 = tpu.matmul %11, %12, %cst_13 {dimension_numbers = #tpu.dot_dimension_numbers<[1], [0], [0], [1], [0, 0, 1, 1], [], []>} : vector<16x128xf32>, vector<128x128xf32>, vector<16x128xf32> -> vector<16x128xf32>
    %c0_14 = arith.constant 0 : index
    %c0_15 = arith.constant 0 : index
    %14 = vector.load %arg7[%c0_14, %c0_15] : memref<1x128xf32, #tpu.memory_space<vmem>>, vector<1x128xf32>
    %15 = vector.broadcast %14 : vector<1x128xf32> to vector<16x128xf32>
    %16 = arith.addf %13, %15 : vector<16x128xf32>
    %cst_16 = arith.constant 0.000000e+00 : f32
    %17 = vector.broadcast %cst_16 : f32 to vector<16x128xf32>
    %18 = arith.maximumf %16, %17 : vector<16x128xf32>
    %c0_17 = arith.constant 0 : index
    %c0_18 = arith.constant 0 : index
    %19 = vector.load %arg8[%c0_17, %c0_18] : memref<128x3xf32, #tpu.memory_space<vmem>>, vector<128x3xf32>
    %cst_19 = arith.constant dense<0.000000e+00> : vector<16x3xf32>
    %20 = tpu.matmul %18, %19, %cst_19 {dimension_numbers = #tpu.dot_dimension_numbers<[1], [0], [0], [1], [0, 0, 1, 1], [], []>} : vector<16x128xf32>, vector<128x3xf32>, vector<16x3xf32> -> vector<16x3xf32>
    %c0_20 = arith.constant 0 : index
    %c0_21 = arith.constant 0 : index
    %21 = vector.load %arg9[%c0_20, %c0_21] : memref<1x3xf32, #tpu.memory_space<vmem>>, vector<1x3xf32>
    %22 = vector.broadcast %21 : vector<1x3xf32> to vector<16x3xf32>
    %23 = arith.addf %20, %22 : vector<16x3xf32>
    %24 = arith.addf %0, %23 : vector<16x3xf32>
    %c0_22 = arith.constant 0 : index
    %c0_23 = arith.constant 0 : index
    %25 = vector.load %arg10[%c0_22, %c0_23] : memref<16x3xf32, #tpu.memory_space<vmem>>, vector<16x3xf32>
    tpu.vector_store %arg10[%c0_22, %c0_23], %24 {strides = array<i32>} : memref<16x3xf32, #tpu.memory_space<vmem>>, vector<16x3xf32>,
    return
  }
  func.func @transform_0(%arg0: i32) -> (i32, i32) {
    %c0_i32 = arith.constant 0 : i32
    %c0_i32_0 = arith.constant 0 : i32
    return %arg0, %c0_i32 : i32, i32
  }
  func.func @transform_1(%arg0: i32) -> (i32, i32) {
    %c0_i32 = arith.constant 0 : i32
    %c0_i32_0 = arith.constant 0 : i32
    return %arg0, %c0_i32 : i32, i32
  }
  func.func @transform_2(%arg0: i32) -> (i32, i32) {
    %c0_i32 = arith.constant 0 : i32
    %c0_i32_0 = arith.constant 0 : i32
    %c0_i32_1 = arith.constant 0 : i32
    return %c0_i32, %c0_i32_0 : i32, i32
  }
  func.func @transform_3(%arg0: i32) -> (i32, i32) {
    %c0_i32 = arith.constant 0 : i32
    %c0_i32_0 = arith.constant 0 : i32
    %c0_i32_1 = arith.constant 0 : i32
    return %c0_i32, %c0_i32_0 : i32, i32
  }
  func.func @transform_4(%arg0: i32) -> (i32, i32) {
    %c0_i32 = arith.constant 0 : i32
    %c0_i32_0 = arith.constant 0 : i32
    %c0_i32_1 = arith.constant 0 : i32
    return %c0_i32, %c0_i32_0 : i32, i32
  }
  func.func @transform_5(%arg0: i32) -> (i32, i32) {
    %c0_i32 = arith.constant 0 : i32
    %c0_i32_0 = arith.constant 0 : i32
    %c0_i32_1 = arith.constant 0 : i32
    return %c0_i32, %c0_i32_0 : i32, i32
  }
  func.func @transform_6(%arg0: i32) -> (i32, i32) {
    %c0_i32 = arith.constant 0 : i32
    %c0_i32_0 = arith.constant 0 : i32
    %c0_i32_1 = arith.constant 0 : i32
    return %c0_i32, %c0_i32_0 : i32, i32
  }
  func.func @transform_7(%arg0: i32) -> (i32, i32) {
    %c0_i32 = arith.constant 0 : i32
    %c0_i32_0 = arith.constant 0 : i32
    %c0_i32_1 = arith.constant 0 : i32
    return %c0_i32, %c0_i32_0 : i32, i32
  }
  func.func @transform_8(%arg0: i32) -> (i32, i32) {
    %c0_i32 = arith.constant 0 : i32
    %c0_i32_0 = arith.constant 0 : i32
    %c0_i32_1 = arith.constant 0 : i32
    return %c0_i32, %c0_i32_0 : i32, i32
  }
  func.func @transform_9(%arg0: i32) -> (i32, i32) {
    %c0_i32 = arith.constant 0 : i32
    %c0_i32_0 = arith.constant 0 : i32
    return %arg0, %c0_i32 : i32, i32
  }
}

</mosaic_0001>

<bundles_post_ra>
// kernel: residual_dynamics_forward.1
= control target key start
LH: loop header
LB: loop body
LE: loop exit
PB: predicated region body
PF: predicated region fallthrough
CT: control target
= control target key end

     0   :  { %vm45_vm0 = vcmask 1042432   ;;  %vm38_vm1 = vcmask 23552   ;;  %s753_s3 = inlined_call_operand.vmem [shape: f32[3,128], index: 3, kind: input, shape index: {}]   ;;  %s754_s2 = inlined_call_operand.vmem [shape: f32[3,128], index: 2, kind: input, shape index: {}]   ;;  %s755_s1 = inlined_call_operand.vmem [shape: f32[16,3], index: 1, kind: input, shape index: {}]   ;;  %s756_s0 = inlined_call_operand.vmem [shape: f32[16,3], index: 0, kind: input, shape index: {}]   ;;  %s757_s5 = inlined_call_operand.vmem [shape: f32[128,128], index: 5, kind: input, shape index: {}]   ;;  %s758_s7 = inlined_call_operand.vmem [shape: f32[128,3], index: 7, kind: input, shape index: {}]   ;;  %s759_s4 = inlined_call_operand.vmem [shape: f32[1,128], index: 4, kind: input, shape index: {}]   ;;  %s760_s6 = inlined_call_operand.vmem [shape: f32[1,128], index: 6, kind: input, shape index: {}]   ;;  %s761_s8 = inlined_call_operand.vmem [shape: f32[1,3], index: 8, kind: input, shape index: {}]   ;;  %s762_s9 = inlined_call_operand.vmem [shape: f32[16,3], index: 9, kind: output, shape index: {}]  }
   0x1   :  { %v37_v0 = vld [vmem:[%s753_s3] sm:$0x7]  ;;  %v35_v3 = vld [vmem:[%s755_s1 + $0x8] sm:$0xff]  ;;  %v234_v6 = vld [vmem:[%s757_s5 + $0x78] sm:$0xff] }
   0x2   :  { %v36_v1 = vld [vmem:[%s754_s2] sm:$0x7]  ;;  %476 = vmatprep.subr.msk.mxu0 %vm45_vm0, %v37_v0  ;;  %v628_v5 = vld [vmem:[%s756_s0 + $0x8] sm:$0xff]  ;;  %v233_v7 = vld [vmem:[%s757_s5 + $0x70] sm:$0xff] }
   0x3   :  { %v34_v2 = vld [vmem:[%s755_s1] sm:$0xff]  ;;  %481 = vmatprep.subr.msk.mxu1 %vm45_vm0, %v36_v1  ;;  %477 = vmatpush3.msk.msra.mxu0 %vm45_vm0, %v37_v0  ;;  %v232_v8 = vld [vmem:[%s757_s5 + $0x68] sm:$0xff]  ;;  %v230_v10 = vld [vmem:[%s757_s5 + $0x58] sm:$0xff] }
   0x4   :  { %v623_v4 = vld [vmem:[%s756_s0] sm:$0xff]  ;;  %478 = vmatprep.mubr.msk.f32.mxu0 %vm38_vm1, %v34_v2  ;;  %482 = vmatpush3.msk.msra.mxu1 %vm45_vm0, %v36_v1  ;;  %v229_v11 = vld [vmem:[%s757_s5 + $0x50] sm:$0xff]  ;;  %v228_v12 = vld [vmem:[%s757_s5 + $0x48] sm:$0xff] }
   0x5   :  { %483 = vmatprep.mubr.msk.f32.mxu1 %vm38_vm1, %v623_v4  ;;  %479 = vmatmul.mubr.msk.f32.vlgmr.msra.gmra.mxu0 %vm38_vm1, %v35_v3  ;;  %v231_v9 = vld [vmem:[%s757_s5 + $0x60] sm:$0xff]  ;;  %v226_v14 = vld [vmem:[%s757_s5 + $0x38] sm:$0xff]  ;;  %v225_v15 = vld [vmem:[%s757_s5 + $0x30] sm:$0xff] }
   0x6   :  { %484 = vmatmul.mubr.msk.f32.vlgmr.msra.gmra.mxu1 %vm38_vm1, %v628_v5  ;;  %486 = vmatprep.subr.mxu0 %v234_v6  ;;  %v227_v13 = vld [vmem:[%s757_s5 + $0x40] sm:$0xff]  ;;  %v224_v16 = vld [vmem:[%s757_s5 + $0x28] sm:$0xff]  ;;  %v222_v18 = vld [vmem:[%s757_s5 + $0x18] sm:$0xff] }
   0x7   :  { %487 = vmatpush3.msra.mxu0 %v234_v6  ;;  %v223_v17 = vld [vmem:[%s757_s5 + $0x20] sm:$0xff]  ;;  %v221_v19 = vld [vmem:[%s757_s5 + $0x10] sm:$0xff]  ;;  %v220_v20 = vld [vmem:[%s757_s5 + $0x8] sm:$0xff] }
   0x8   :  { %488 = vmatprep.subr.mxu0 %v233_v7  ;;  %v219_v21 = vld [vmem:[%s757_s5] sm:$0xff]  ;;  %v334_v22 = vld [vmem:[%s758_s7 + $0x78] sm:$0xff]  ;;  %v333_v23 = vld [vmem:[%s758_s7 + $0x70] sm:$0xff] }
   0x9   :  { %489 = vmatpush3.msra.mxu0 %v233_v7  ;;  %521 = vmatprep.subr.mxu1 %v334_v22  ;;  %v332_v24 = vld [vmem:[%s758_s7 + $0x68] sm:$0xff]  ;;  %v331_v25 = vld [vmem:[%s758_s7 + $0x60] sm:$0xff]  ;;  %v330_v26 = vld [vmem:[%s758_s7 + $0x58] sm:$0xff] }
   0xa   :  { %490 = vmatprep.subr.mxu0 %v232_v8  ;;  %522 = vmatpush3.msra.mxu1 %v334_v22  ;;  %v329_v27 = vld [vmem:[%s758_s7 + $0x50] sm:$0xff]  ;;  %v328_v28 = vld [vmem:[%s758_s7 + $0x48] sm:$0xff]  ;;  %v327_v29 = vld [vmem:[%s758_s7 + $0x40] sm:$0xff] }
   0xb   :  { %491 = vmatpush3.msra.mxu0 %v232_v8  ;;  %523 = vmatprep.subr.mxu1 %v333_v23  ;;  %v326_v30 = vld [vmem:[%s758_s7 + $0x38] sm:$0xff]  ;;  %v325_v31 = vld [vmem:[%s758_s7 + $0x30] sm:$0xff]  ;;  %v324_v32 = vld [vmem:[%s758_s7 + $0x28] sm:$0xff] }
   0xc   :  { %492 = vmatprep.subr.mxu0 %v231_v9  ;;  %524 = vmatpush3.msra.mxu1 %v333_v23  ;;  %v323_v33 = vld [vmem:[%s758_s7 + $0x20] sm:$0xff]  ;;  %v322_v45 = vld [vmem:[%s758_s7 + $0x18] sm:$0xff]  ;;  %v321_v46 = vld [vmem:[%s758_s7 + $0x10] sm:$0xff] }
   0xd   :  { %493 = vmatpush3.msra.mxu0 %v231_v9  ;;  %525 = vmatprep.subr.mxu1 %v332_v24  ;;  %v431_v37 = vld [vmem:[%s759_s4] ss:$0 sm:$0xff]  ;;  %v320_v47 = vld [vmem:[%s758_s7 + $0x8] sm:$0xff] }
   0xe   :  { %494 = vmatprep.subr.mxu0 %v230_v10  ;;  %526 = vmatpush3.msra.mxu1 %v332_v24  ;;  %v319_v48 = vld [vmem:[%s758_s7] sm:$0xff] }
   0xf   :  { %495 = vmatpush3.msra.mxu0 %v230_v10  ;;  %527 = vmatprep.subr.mxu1 %v331_v25  ;;  %v432_v49 = vld [vmem:[%s760_s6] ss:$0 sm:$0xff] }
  0x10   :  { %496 = vmatprep.subr.mxu0 %v229_v11  ;;  %528 = vmatpush3.msra.mxu1 %v331_v25  ;;  %v433_v56 = vld [vmem:[%s761_s8] ss:$0 sm:$0xff] }
  0x11   :  { %497 = vmatpush3.msra.mxu0 %v229_v11  ;;  %529 = vmatprep.subr.mxu1 %v330_v26 }
  0x12   :  { %498 = vmatprep.subr.mxu0 %v228_v12  ;;  %530 = vmatpush3.msra.mxu1 %v330_v26 }
  0x13   :  { %499 = vmatpush3.msra.mxu0 %v228_v12  ;;  %531 = vmatprep.subr.mxu1 %v329_v27 }
  0x14   :  { %500 = vmatprep.subr.mxu0 %v227_v13  ;;  %532 = vmatpush3.msra.mxu1 %v329_v27 }
  0x15   :  { %501 = vmatpush3.msra.mxu0 %v227_v13  ;;  %533 = vmatprep.subr.mxu1 %v328_v28 }
  0x16   :  { %502 = vmatprep.subr.mxu0 %v226_v14  ;;  %534 = vmatpush3.msra.mxu1 %v328_v28 }
  0x17   :  { %503 = vmatpush3.msra.mxu0 %v226_v14  ;;  %535 = vmatprep.subr.mxu1 %v327_v29 }
  0x18   :  { %504 = vmatprep.subr.mxu0 %v225_v15  ;;  %536 = vmatpush3.msra.mxu1 %v327_v29 }
  0x19   :  { %505 = vmatpush3.msra.mxu0 %v225_v15  ;;  %537 = vmatprep.subr.mxu1 %v326_v30 }
  0x1a   :  { %506 = vmatprep.subr.mxu0 %v224_v16  ;;  %538 = vmatpush3.msra.mxu1 %v326_v30 }
  0x1b   :  { %507 = vmatpush3.msra.mxu0 %v224_v16  ;;  %539 = vmatprep.subr.mxu1 %v325_v31 }
  0x1c   :  { %508 = vmatprep.subr.mxu0 %v223_v17  ;;  %540 = vmatpush3.msra.mxu1 %v325_v31 }
  0x1d   :  { %509 = vmatpush3.msra.mxu0 %v223_v17  ;;  %541 = vmatprep.subr.mxu1 %v324_v32 }
  0x1e   :  { %510 = vmatprep.subr.mxu0 %v222_v18  ;;  %542 = vmatpush3.msra.mxu1 %v324_v32 }
  0x1f   :  { %511 = vmatpush3.msra.mxu0 %v222_v18  ;;  %543 = vmatprep.subr.mxu1 %v323_v33 }
  0x20   :  { %512 = vmatprep.subr.mxu0 %v221_v19  ;;  %544 = vmatpush3.msra.mxu1 %v323_v33 }
  0x21   :  { %513 = vmatpush3.msra.mxu0 %v221_v19  ;;  %545 = vmatprep.subr.mxu1 %v322_v45 }
  0x22   :  { %514 = vmatprep.subr.mxu0 %v220_v20  ;;  %546 = vmatpush3.msra.mxu1 %v322_v45 }
  0x23   :  { %515 = vmatpush3.msra.mxu0 %v220_v20  ;;  %547 = vmatprep.subr.mxu1 %v321_v46 }
  0x24   :  { %516 = vmatprep.subr.mxu0 %v219_v21  ;;  %548 = vmatpush3.msra.mxu1 %v321_v46 }
  0x25   :  { %517 = vmatpush3.msra.mxu0 %v219_v21  ;;  %549 = vmatprep.subr.mxu1 %v320_v47 }
  0x26   :  { %550 = vmatpush3.msra.mxu1 %v320_v47 }
  0x27   :  { %551 = vmatprep.subr.mxu1 %v319_v48 }
  0x28   :  { %552 = vmatpush3.msra.mxu1 %v319_v48 }
  0xc5   :  { %v480_v34 = vpop.f32.mrf.mxu0 }
  0xc6   :  { %v485_v35 = vpop.f32.mrf.mxu1 }
  0xc7   :  { %v205_v36 = vadd.f32 %v485_v35, %v480_v34  ;;  %v115_v38 = vpop.f32.mrf.mxu0 }
  0xc8   :  { %v199_v39 = vpop.f32.mrf.mxu1 }
  0xc9   :  { %v200_v40 = vadd.f32 %v199_v39, %v115_v38  ;;  %v216_v41 = vadd.f32 %v431_v37, %v205_v36 }
  0xcb   :  { %v215_v42 = vadd.f32 %v431_v37, %v200_v40  ;;  %v218_v44 = vmax.f32 %v216_v41, 0.0 }
  0xcd   :  { %v217_v43 = vmax.f32 %v215_v42, 0.0 }
  0xcf   :  { %518 = vmatprep.mubr.f32.mxu0 %v217_v43 }
  0xd0   :  { %519 = vmatmul.mubr.f32.vlgmr.msra.gmra.mxu0 %v218_v44 }
 0x190   :  { %v520_v50 = vpop.f32.mrf.mxu0 }
 0x191   :  { %v314_v51 = vadd.f32 %v520_v50, %v432_v49 }
 0x192   :  { %v308_v52 = vpop.f32.mrf.mxu0 }
 0x193   :  { %v309_v53 = vadd.f32 %v432_v49, %v308_v52  ;;  %v318_v55 = vmax.f32 %v314_v51, 0.0 }
 0x195   :  { %v317_v54 = vmax.f32 %v309_v53, 0.0 }
 0x197   :  { %553 = vmatprep.mubr.f32.mxu1 %v317_v54 }
 0x198   :  { %554 = vmatmul.mubr.f32.vlgmr.msra.gmra.mxu1 %v318_v55 }
 0x258   :  { %v555_v57 = vpop.f32.mrf.mxu1 }
 0x259   :  { %v414_v58 = vadd.f32 %v555_v57, %v433_v56 }
 0x25a   :  { %v408_v59 = vpop.f32.mrf.mxu1 }
 0x25b   :  { %v418_v60 = vadd.f32 %v414_v58, %v628_v5  ;;  %v409_v61 = vadd.f32 %v433_v56, %v408_v59 }
 0x25d   :  { %420 = vst.msk [vmem:[%s762_s9 + $0x8] sm:$0xff] %vm38_vm1, %v418_v60  ;;  %v417_v62 = vadd.f32 %v409_v61, %v623_v4 }
 0x25f   :  { %419 = vst.msk [vmem:[%s762_s9] sm:$0xff] %vm38_vm1, %v417_v62 }

</bundles_post_ra>
